<compile_context>
chip_gen: v7x
topology: tpu7x:2x2x1
jax: 0.10.0
libtpu: 0.0.40
codegen_flags: <defaults>
</compile_context>

<pallas_src>
import math

import jax
import jax.numpy as jnp
from jax.experimental import pallas as pl
from jax.experimental.pallas import tpu as pltpu


def _round_up(x, m):
    return ((x + m - 1) // m) * m


def _vmem_budget(resident_bytes, per_tile_bytes):
    # resident weights/biases + double-buffered per-tile traffic + slack,
    # clamped to a range that is safe on v7x (64 MiB physical VMEM per TC).
    need = resident_bytes + 2 * per_tile_bytes + (2 << 20)
    return int(min(64 * 2**20, max(16 * 2**20, 2 * need)))


# ----------------------------- Pallas kernels ------------------------------

def _linear_kernel(x_ref, w_ref, o_ref):
    # out = x @ W   (W stored pre-transposed as (K, N); f32 MXU accumulate)
    o_ref[...] = jnp.dot(
        x_ref[...], w_ref[...], preferred_element_type=jnp.float32
    ).astype(o_ref.dtype)


def _mlp_kernel(x_ref, w1_ref, b1_ref, w2_ref, b2_ref, o_ref):
    # out = relu(x @ W1 + b1) @ W2 + b2   (weights pre-transposed)
    h = jnp.dot(x_ref[...], w1_ref[...], preferred_element_type=jnp.float32)
    h = jnp.maximum(h + b1_ref[...], 0.0)              # bias + ReLU in f32 (VPU)
    out = jnp.dot(h.astype(w2_ref.dtype), w2_ref[...],
                  preferred_element_type=jnp.float32)
    o_ref[...] = (out + b2_ref[...]).astype(o_ref.dtype)


# ------------------------------ JAX wrapper --------------------------------

class EmbeddingMapping:
    """JAX/Pallas port of the PyTorch EmbeddingMapping module."""

    _LANE = 128       # lane width (last-dim alignment)
    _SUBLANE = 8      # sublane alignment for batch tiles
    _MAX_TILE_B = 512 # batch rows per grid step (sweepable)

    def __init__(self, input_dim, output_dim, nonlinear=False, hidden_dim=256,
                 key=None, dtype=jnp.float32):
        self.nonlinear = nonlinear
        self.input_dim = input_dim
        self.output_dim = output_dim
        self.hidden_dim = hidden_dim
        self.dtype = dtype

        self._k_pad = _round_up(input_dim, self._LANE)
        self._n_pad = _round_up(output_dim, self._LANE)
        self._h_pad = _round_up(hidden_dim, self._LANE)

        if key is None:
            key = jax.random.PRNGKey(0)

        def kaiming_uniform(k, fan_out, fan_in):
            # kaiming_uniform_ with a=sqrt(5): bound = sqrt(6/((1+a^2)*fan_in))
            #                                        = sqrt(1/fan_in)
            bound = math.sqrt(1.0 / fan_in)
            return jax.random.uniform(k, (fan_out, fan_in), dtype=jnp.float32,
                                      minval=-bound, maxval=bound)

        def pad_transpose(w_pt, rows_pad, cols_pad):
            # PyTorch (out, in) layout -> pre-transposed, zero-padded (in_pad, out_pad)
            wt = w_pt.T.astype(dtype)
            return jnp.pad(wt, ((0, rows_pad - wt.shape[0]),
                                (0, cols_pad - wt.shape[1])))

        if nonlinear:
            k1, k2 = jax.random.split(key)
            # Logical (PyTorch-layout) params kept for reference / inspection.
            self.w1 = kaiming_uniform(k1, hidden_dim, input_dim)    # (H, K)
            self.b1 = jnp.zeros((hidden_dim,), dtype=jnp.float32)   # zeros, per spec
            self.w2 = kaiming_uniform(k2, output_dim, hidden_dim)   # (N, H)
            self.b2 = jnp.zeros((output_dim,), dtype=jnp.float32)
            # Kernel-side padded, pre-transposed storage.
            self._w1p = pad_transpose(self.w1, self._k_pad, self._h_pad)
            self._b1p = jnp.pad(self.b1.astype(dtype),
                                (0, self._h_pad - hidden_dim))[None, :]
            self._w2p = pad_transpose(self.w2, self._h_pad, self._n_pad)
            self._b2p = jnp.pad(self.b2.astype(dtype),
                                (0, self._n_pad - output_dim))[None, :]
        else:
            self.W = kaiming_uniform(key, output_dim, input_dim)    # (N, K)
            self._Wp = pad_transpose(self.W, self._k_pad, self._n_pad)

    def __call__(self, x):
        batch, in_dim = x.shape
        assert in_dim == self.input_dim

        tile_b = min(self._MAX_TILE_B, _round_up(batch, self._SUBLANE))
        b_pad = _round_up(batch, tile_b)
        grid = (b_pad // tile_b,)

        # Pad batch + feature dims with zeros so every block is (8,128)-aligned.
        xp = jnp.pad(x.astype(self.dtype),
                     ((0, b_pad - batch), (0, self._k_pad - in_dim)))

        itemsize = jnp.dtype(self.dtype).itemsize
        x_spec = pl.BlockSpec((tile_b, self._k_pad), lambda i: (i, 0))
        out_spec = pl.BlockSpec((tile_b, self._n_pad), lambda i: (i, 0))
        out_shape = jax.ShapeDtypeStruct((b_pad, self._n_pad), self.dtype)

        if self.nonlinear:
            # Weights / biases resident across the whole batch grid.
            w1_spec = pl.BlockSpec((self._k_pad, self._h_pad), lambda i: (0, 0))
            b1_spec = pl.BlockSpec((1, self._h_pad), lambda i: (0, 0))
            w2_spec = pl.BlockSpec((self._h_pad, self._n_pad), lambda i: (0, 0))
            b2_spec = pl.BlockSpec((1, self._n_pad), lambda i: (0, 0))

            flops = (2 * b_pad * self._k_pad * self._h_pad
                     + 2 * b_pad * self._h_pad * self._n_pad)
            bytes_accessed = itemsize * (
                b_pad * self._k_pad
                + self._k_pad * self._h_pad + self._h_pad
                + self._h_pad * self._n_pad + self._n_pad
                + b_pad * self._n_pad)
            resident = itemsize * (self._k_pad * self._h_pad
                                   + self._h_pad * self._n_pad
                                   + self._h_pad + self._n_pad)
            per_tile = (itemsize * tile_b * (self._k_pad + self._n_pad)
                        + 4 * tile_b * self._h_pad)   # f32 hidden activation

            out_p = pl.pallas_call(
                _mlp_kernel,
                out_shape=out_shape,
                grid=grid,
                in_specs=[x_spec, w1_spec, b1_spec, w2_spec, b2_spec],
                out_specs=out_spec,
                compiler_params=pltpu.CompilerParams(
                    dimension_semantics=("parallel",),
                    vmem_limit_bytes=_vmem_budget(resident, per_tile)),
                cost_estimate=pl.CostEstimate(
                    flops=flops, transcendentals=0,
                    bytes_accessed=bytes_accessed),
            )(xp, self._w1p, self._b1p, self._w2p, self._b2p)
        else:
            w_spec = pl.BlockSpec((self._k_pad, self._n_pad), lambda i: (0, 0))

            flops = 2 * b_pad * self._k_pad * self._n_pad
            bytes_accessed = itemsize * (b_pad * self._k_pad
                                         + self._k_pad * self._n_pad
                                         + b_pad * self._n_pad)
            resident = itemsize * self._k_pad * self._n_pad
            per_tile = itemsize * tile_b * (self._k_pad + self._n_pad)

            out_p = pl.pallas_call(
                _linear_kernel,
                out_shape=out_shape,
                grid=grid,
                in_specs=[x_spec, w_spec],
                out_specs=out_spec,
                compiler_params=pltpu.CompilerParams(
                    dimension_semantics=("parallel",),
                    vmem_limit_bytes=_vmem_budget(resident, per_tile)),
                cost_estimate=pl.CostEstimate(
                    flops=flops, transcendentals=0,
                    bytes_accessed=bytes_accessed),
            )(xp, self._Wp)

        # Slice off the lane / batch padding.
        return out_p[:batch, :self.output_dim]


# --------------------------------- main ------------------------------------

if __name__ == "__main__":
    key = jax.random.PRNGKey(0)
    k_x, k_lin, k_mlp = jax.random.split(key, 3)

    batch, input_dim, output_dim, hidden_dim = 8, 32, 64, 128
    x = jax.random.normal(k_x, (batch, input_dim), dtype=jnp.float32)

    # ---- linear path: out = x @ W.T
    lin = EmbeddingMapping(input_dim, output_dim, nonlinear=False, key=k_lin)
    out_lin = jax.block_until_ready(lin(x))
    ref_lin = x @ lin.W.T
    assert out_lin.shape == (batch, output_dim)
    assert jnp.allclose(out_lin, ref_lin, atol=3e-5, rtol=1e-5)

    # ---- nonlinear path: out = fc2(relu(fc1(x)))
    mlp = EmbeddingMapping(input_dim, output_dim, nonlinear=True,
                           hidden_dim=hidden_dim, key=k_mlp)
    out_mlp = jax.block_until_ready(mlp(x))
    ref_mlp = jnp.maximum(x @ mlp.w1.T + mlp.b1, 0.0) @ mlp.w2.T + mlp.b2
    assert out_mlp.shape == (batch, output_dim)
    assert jnp.allclose(out_mlp, ref_mlp, atol=3e-5, rtol=1e-5)

    print("KERNEL_OK")
</pallas_src>

<mosaic_0001>
module attributes {stable_mosaic.version = 11 : i64} {
  func.func @_linear_kernel(%arg0: i32, %arg1: memref<8x128xf32, #tpu.memory_space<vmem>>, %arg2: memref<128x128xf32, #tpu.memory_space<vmem>>, %arg3: memref<8x128xf32, #tpu.memory_space<vmem>>) attributes {dimension_semantics = [#tpu.dimension_semantics<parallel>], iteration_bounds = array<i64: 1>, scalar_prefetch = 0 : i64, scratch_operands = 0 : i64, tpu.core_type = #tpu.core_type<tc>, window_params = [{transform_indices = @transform_0, window_bounds = array<i64: 8, 128>}, {pipeline_mode = #tpu.pipeline_mode<synchronous>, transform_indices = @transform_1, window_bounds = array<i64: 128, 128>}, {transform_indices = @transform_2, window_bounds = array<i64: 8, 128>}]} {
    %c0 = arith.constant 0 : index
    %c0_0 = arith.constant 0 : index
    %0 = vector.load %arg1[%c0, %c0_0] : memref<8x128xf32, #tpu.memory_space<vmem>>, vector<8x128xf32>
    %c0_1 = arith.constant 0 : index
    %c0_2 = arith.constant 0 : index
    %1 = vector.load %arg2[%c0_1, %c0_2] : memref<128x128xf32, #tpu.memory_space<vmem>>, vector<128x128xf32>
    %cst = arith.constant dense<0.000000e+00> : vector<8x128xf32>
    %2 = tpu.matmul %0, %1, %cst {dimension_numbers = #tpu.dot_dimension_numbers<[1], [0], [0], [1], [0, 0, 1, 1], [], []>} : vector<8x128xf32>, vector<128x128xf32>, vector<8x128xf32> -> vector<8x128xf32>
    %c0_3 = arith.constant 0 : index
    %c0_4 = arith.constant 0 : index
    %3 = vector.load %arg3[%c0_3, %c0_4] : memref<8x128xf32, #tpu.memory_space<vmem>>, vector<8x128xf32>
    tpu.vector_store %arg3[%c0_3, %c0_4], %2 {strides = array<i32>} : memref<8x128xf32, #tpu.memory_space<vmem>>, vector<8x128xf32>,
    return
  }
  func.func @transform_0(%arg0: i32) -> (i32, i32) {
    %c0_i32 = arith.constant 0 : i32
    %c0_i32_0 = arith.constant 0 : i32
    return %arg0, %c0_i32 : i32, i32
  }
  func.func @transform_1(%arg0: i32) -> (i32, i32) {
    %c0_i32 = arith.constant 0 : i32
    %c0_i32_0 = arith.constant 0 : i32
    %c0_i32_1 = arith.constant 0 : i32
    return %c0_i32, %c0_i32_0 : i32, i32
  }
  func.func @transform_2(%arg0: i32) -> (i32, i32) {
    %c0_i32 = arith.constant 0 : i32
    %c0_i32_0 = arith.constant 0 : i32
    return %arg0, %c0_i32 : i32, i32
  }
}

</mosaic_0001>

<bundles_post_ra>
// kernel: tpu_custom_call.1
= control target key start
LH: loop header
LB: loop body
LE: loop exit
PB: predicated region body
PF: predicated region fallthrough
CT: control target
= control target key end

     0   :  { %7 = vsyncpa [#allocation3], 0  ;;  %s364_s0 = inlined_call_operand.hbm [shape: f32[8,128], index: 0, kind: input, shape index: {}]   ;;  %s365_s1 = inlined_call_operand.hbm [shape: f32[128,128], index: 1, kind: input, shape index: {}]   ;;  %s366_s2 = inlined_call_operand.hbm [shape: f32[8,128], index: 2, kind: output, shape index: {}]  }
   0x1   :  { %8 = vsyncpa [#allocation6], 0 }
   0x2   :  { %9 = vsyncpa [#allocation4], 0  ;;  %s298_s9 = smov [#allocation2]   ;;  %s299_s11 = smov [#allocation5]  }
   0x3   :  { %s16_s10 = sshll.u32 %s298_s9, 4  ;;  %s25_s12 = sshll.u32 %s299_s11, 4  ;;  %s17_s10 = int_to_ptr.vmem [resolvable:$true] %s16_s10  ;;  %s321_s12 = int_to_ptr.vmem [resolvable:$true] %s25_s12 }
   0x4   :  { %s226_s15 = scalar_lea.hbm %s364_s0, 128 }
   0x5   :  { %p227_p0 = scmp.ne.s32.totalorder %s364_s0, %s226_s15  ;;  %p230_p1 = scmp.lt.u32.totalorder %s226_s15, %s364_s0 }
   0x7   :  { %p232_p2 = pnand %p230_p1, %p227_p0 }
   0x9   :  { %235 = shalt.err (!%p232_p2)
}
   0xa   :  { %s236_s20 = scalar_lea.vmem %s17_s10, 128  ;;  %p241_p4 = scmp.lt.s32.totalorder %s17_s10, %s17_s10 }
   0xb   :  { %p237_p3 = scmp.ne.s32.totalorder %s17_s10, %s236_s20  ;;  %p242_p5 = scmp.lt.s32.totalorder %s236_s20, %s236_s20 }
   0xd   :  { %p243_p6 = por %p242_p5, %p241_p4 }
   0xf   :  { %p244_p7 = pnand %p243_p6, %p237_p3 }
  0x11   :  { %247 = shalt.err (!%p244_p7)
}
  0x12   :  { %19 = dma.hbm_to_vmem [thread:$0]  %s364_s0, 128, %s17_s10, [#allocation3]  }
  0x13   :  { %s248_s25 = scalar_lea.hbm %s365_s1, 2048 }
  0x14   :  { %p249_p8 = scmp.ne.s32.totalorder %s365_s1, %s248_s25  ;;  %p252_p9 = scmp.lt.u32.totalorder %s248_s25, %s365_s1 }
  0x16   :  { %p254_p10 = pnand %p252_p9, %p249_p8 }
  0x18   :  { %257 = shalt.err (!%p254_p10)
}
  0x19   :  { %s258_s30 = scalar_lea.vmem %s321_s12, 2048  ;;  %p263_p12 = scmp.lt.s32.totalorder %s321_s12, %s321_s12 }
  0x1a   :  { %p259_p11 = scmp.ne.s32.totalorder %s321_s12, %s258_s30  ;;  %p264_p13 = scmp.lt.s32.totalorder %s258_s30, %s258_s30 }
  0x1c   :  { %p265_p0 = por %p264_p13, %p263_p12 }
  0x1e   :  { %p266_p1 = pnand %p265_p0, %p259_p11 }
  0x20   :  { %269 = shalt.err (!%p266_p1)
}
  0x21   :  { %s300_s0 = smov 128   ;;  %s301_s3 = smov 8  }
  0x22   :  { %31 = dma.hbm_to_vmem [thread:$0]  %s365_s1, 2048, %s321_s12, [#allocation6], %s300_s0, %s300_s0, %s301_s3  }
  0x23   :  { %292 = dma.done.wait [#allocation3], 128  }
  0x24   :  { %293 = vsyncadd [#allocation3], 4294967168 }
  0x25   :  { %294 = dma.done.wait [#allocation6], 2048  }
  0x26   :  { %295 = vsyncadd [#allocation6], 4294965248  ;;  %v302_v0 = vmov 0.0|0.0   ;;  %vm303_vm0 = vmmov 0   ;;  %v304_v1 = vmov 0.0   ;;  %v39_v2 = vld [vmem:[#allocation5] sm:$0xff] }
  0x27   :  { %194 = vmatprep.subr.bf16.mxu0 %v302_v0  ;;  %191 = vmatprep.mubr.msk.f32.mxu0 %vm303_vm0, %v304_v1  ;;  %v40_v3 = vld [vmem:[#allocation5 + $0x8] sm:$0xff]  ;;  %v41_v4 = vld [vmem:[#allocation5 + $0x10] sm:$0xff]  ;;  %v42_v6 = vld [vmem:[#allocation5 + $0x18] sm:$0xff]  ;;  %s305_s1 = smov [#allocation7]  }
  0x28   :  { %v195_v5 = vpack.c.bf16 %v40_v3, %v39_v2  ;;  %v198_v7 = vpack.c.bf16 %v42_v6, %v41_v4  ;;  %v43_v8 = vld [vmem:[#allocation5 + $0x20] sm:$0xff]  ;;  %v44_v9 = vld [vmem:[#allocation5 + $0x28] sm:$0xff]  ;;  %v45_v11 = vld [vmem:[#allocation5 + $0x30] sm:$0xff]  ;;  %s132_s6 = sshll.u32 %s305_s1, 4  ;;  %s133_s6 = int_to_ptr.vmem [resolvable:$true] %s132_s6 }
  0x29   :  { %v201_v10 = vpack.c.bf16 %v44_v9, %v43_v8  ;;  %v46_v12 = vld [vmem:[#allocation5 + $0x38] sm:$0xff]  ;;  %v47_v14 = vld [vmem:[#allocation5 + $0x40] sm:$0xff]  ;;  %v48_v15 = vld [vmem:[#allocation5 + $0x48] sm:$0xff]  ;;  %s270_s7 = scalar_lea.vmem %s133_s6, 128  ;;  %p275_p3 = scmp.lt.s32.totalorder %s133_s6, %s133_s6 }
  0x2a   :  { %196 = vmatpush3.bf16.msra.mxu0 %v195_v5  ;;  %v204_v13 = vpack.c.bf16 %v46_v12, %v45_v11  ;;  %v207_v16 = vpack.c.bf16 %v48_v15, %v47_v14  ;;  %v49_v17 = vld [vmem:[#allocation5 + $0x50] sm:$0xff]  ;;  %v50_v18 = vld [vmem:[#allocation5 + $0x58] sm:$0xff]  ;;  %v51_v20 = vld [vmem:[#allocation5 + $0x60] sm:$0xff]  ;;  %p271_p2 = scmp.ne.s32.totalorder %s133_s6, %s270_s7  ;;  %p276_p4 = scmp.lt.s32.totalorder %s270_s7, %s270_s7 }
  0x2b   :  { %197 = vmatprep.subr.bf16.mxu0 %v302_v0  ;;  %v210_v19 = vpack.c.bf16 %v50_v18, %v49_v17  ;;  %v52_v21 = vld [vmem:[#allocation5 + $0x68] sm:$0xff]  ;;  %v53_v23 = vld [vmem:[#allocation5 + $0x70] sm:$0xff]  ;;  %v54_v24 = vld [vmem:[#allocation5 + $0x78] sm:$0xff] }
  0x2c   :  { %v213_v22 = vpack.c.bf16 %v52_v21, %v51_v20  ;;  %v216_v25 = vpack.c.bf16 %v54_v24, %v53_v23  ;;  %v38_v26 = vld [vmem:[#allocation2] sm:$0xff]  ;;  %p277_p5 = por %p276_p4, %p275_p3 }
  0x2e   :  { %199 = vmatpush3.bf16.msra.mxu0 %v198_v7  ;;  %p278_p6 = pnand %p277_p5, %p271_p2 }
  0x2f   :  { %200 = vmatprep.subr.bf16.mxu0 %v302_v0 }
  0x32   :  { %202 = vmatpush3.bf16.msra.mxu0 %v201_v10 }
  0x33   :  { %203 = vmatprep.subr.bf16.mxu0 %v302_v0 }
  0x36   :  { %205 = vmatpush3.bf16.msra.mxu0 %v204_v13 }
  0x37   :  { %206 = vmatprep.subr.bf16.mxu0 %v302_v0 }
  0x3a   :  { %208 = vmatpush3.bf16.msra.mxu0 %v207_v16 }
  0x3b   :  { %209 = vmatprep.subr.bf16.mxu0 %v302_v0 }
  0x3e   :  { %211 = vmatpush3.bf16.msra.mxu0 %v210_v19 }
  0x3f   :  { %212 = vmatprep.subr.bf16.mxu0 %v302_v0 }
  0x42   :  { %214 = vmatpush3.bf16.msra.mxu0 %v213_v22 }
  0x43   :  { %215 = vmatprep.subr.bf16.mxu0 %v302_v0 }
  0x46   :  { %217 = vmatpush3.bf16.msra.mxu0 %v216_v25 }
  0x49   :  { %192 = vmatmul.mubr.f32.vlgmr.msra.gmra.mrb[0].mxu0 %v38_v26 }
 0x11c   :  { %v121_v27 = vpop.f32.mrb[0].mxu0 }
 0x11d   :  { %125 = vst [vmem:[#allocation7] sm:$0xff] %v121_v27  ;;  %v193_v28 = vpop.f32.mrb[1].mxu0 }
 0x11e   :  { %281 = shalt.err (!%p278_p6)
}
 0x11f   :  { %s282_s10 = scalar_lea.hbm %s366_s2, 128 }
 0x120   :  { %p283_p7 = scmp.ne.s32.totalorder %s366_s2, %s282_s10  ;;  %p286_p8 = scmp.lt.u32.totalorder %s282_s10, %s366_s2 }
 0x122   :  { %p288_p9 = pnand %p286_p8, %p283_p7 }
 0x124   :  { %291 = shalt.err (!%p288_p9)
}
 0x125   :  { %135 = dma.vmem_to_hbm [thread:$0]  %s133_s6, 128, %s366_s2, [#allocation4]  }
 0x126   :  { %296 = dma.done.wait [#allocation4], 128  }
 0x127   :  { %297 = vsyncadd [#allocation4], 4294967168 }
 0x128   :  { %139 = vsyncpa [#allocation3], 1 }
 0x129   :  { %140 = vsyncpa [#allocation6], 1 }
 0x12a   :  { %141 = vsyncpa [#allocation4], 1 }

</bundles_post_ra>
